<compile_context>
chip_gen: v6e
topology: v6e:2x2x1
jax: 0.10.0
libtpu: 0.0.40
codegen_flags: <defaults>
</compile_context>

<pallas_src>
import jax
import jax.numpy as jnp
from jax.experimental import pallas as pl
from jax.experimental.pallas import tpu as pltpu


def res_kernel(xt_ref, w_ref, b_ref, o_ref):
    # xt_ref: (D, TB) activations, feature-major (batch on lanes)
    # w_ref : (3, H, H) weights in PyTorch (out_features, in_features) order
    # b_ref : (3, H, 1) float32 biases
    xt = xt_ref[...]
    w1, w2, w3 = w_ref[0], w_ref[1], w_ref[2]
    b1, b2, b3 = b_ref[0], b_ref[1], b_ref[2]

    # fc1 + tanh   (W @ x^T == (x @ W^T)^T); tanh goes to the EUP slot.
    h1 = jnp.tanh(jnp.dot(w1, xt, preferred_element_type=jnp.float32) + b1)
    # residual add (f32 VPU math — safe on v5e even with bf16 I/O)
    z = xt.astype(jnp.float32) + h1
    # fc2 + tanh
    h2 = jnp.tanh(
        jnp.dot(w2, z.astype(w2.dtype), preferred_element_type=jnp.float32) + b2
    )
    # fc3 (no activation); lane-dense full-width store.
    o_ref[...] = (
        jnp.dot(w3, h2.astype(w3.dtype), preferred_element_type=jnp.float32) + b3
    ).astype(o_ref.dtype)


def _round_up(n, m):
    return ((n + m - 1) // m) * m


def _pick_tile(bp, max_tile):
    """Largest multiple of 128 (<= max_tile) dividing bp; prefer >= 2 tiles."""
    cap = min(max_tile, bp)
    if bp >= 256:
        cap = min(cap, bp // 2)          # at least 2 grid steps for megacore
    cap = (cap // 128) * 128
    for t in range(cap, 127, -128):      # small trace-time loop (<= 32 iters)
        if bp % t == 0:
            return t
    return 128


def res_forward_feature_major(xt, w_packed, b_packed, *, max_tile=4096,
                              io_dtype=None):
    """Fast path. xt: (D, B) feature-major activations. Returns (D, B)."""
    D, B = xt.shape
    H = w_packed.shape[1]
    assert D == H, "residual add requires input_dim == hidden_dim"

    if io_dtype is not None:
        xt = xt.astype(io_dtype)
        w_packed = w_packed.astype(io_dtype)
    b_packed = b_packed.astype(jnp.float32)  # biases stay f32 (tiny)

    # Pad batch (lane axis) up to a multiple of 128, then tile it with a
    # divisor so no further padding is required.
    Bp = _round_up(B, 128)
    tile_b = _pick_tile(Bp, max_tile)
    if Bp != B:
        xt = jnp.pad(xt, ((0, 0), (0, Bp - B)))

    out_t = pl.pallas_call(
        res_kernel,
        out_shape=jax.ShapeDtypeStruct((D, Bp), xt.dtype),
        grid_spec=pltpu.PrefetchScalarGridSpec(
            num_scalar_prefetch=0,
            grid=(Bp // tile_b,),
            in_specs=[
                pl.BlockSpec((D, tile_b), lambda i: (0, i)),        # x^T tile
                pl.BlockSpec(w_packed.shape, lambda i: (0, 0, 0)),  # all weights
                pl.BlockSpec(b_packed.shape, lambda i: (0, 0, 0)),  # all biases
            ],
            out_specs=pl.BlockSpec((D, tile_b), lambda i: (0, i)),  # lane-dense
        ),
        compiler_params=pltpu.CompilerParams(
            dimension_semantics=("parallel",),
        ),
    )(xt, w_packed, b_packed)
    return out_t[:, :B]


def res_forward(x, w_packed, b_packed, *, max_tile=4096, io_dtype=None):
    """PyTorch-layout API: x is (B, D), returns (B, D).

    Note: the transposes here are XLA ops around the kernel; callers that can
    keep activations feature-major should use res_forward_feature_major
    directly to keep the lane-dense win.
    """
    out_t = res_forward_feature_major(x.T, w_packed, b_packed,
                                      max_tile=max_tile, io_dtype=io_dtype)
    return out_t.T.astype(x.dtype)


def init_params(key, input_dim, hidden_dim):
    """nn.Linear-style init (uniform(+-1/sqrt(fan_in))).
    Weights in PyTorch (out_features, in_features) order, packed:
      W: (3, H, H)   b: (3, H, 1)   (requires input_dim == hidden_dim)."""
    assert input_dim == hidden_dim
    ks = jax.random.split(key, 6)

    def lin(kw, kb, fan_in, fan_out):
        bound = 1.0 / jnp.sqrt(fan_in)
        w = jax.random.uniform(kw, (fan_out, fan_in), jnp.float32, -bound, bound)
        b = jax.random.uniform(kb, (fan_out, 1), jnp.float32, -bound, bound)
        return w, b

    w1, b1 = lin(ks[0], ks[1], input_dim, hidden_dim)
    w2, b2 = lin(ks[2], ks[3], hidden_dim, hidden_dim)
    w3, b3 = lin(ks[4], ks[5], hidden_dim, input_dim)
    return jnp.stack([w1, w2, w3]), jnp.stack([b1, b2, b3])


def res_reference(x, W, b):
    w1, w2, w3 = W[0], W[1], W[2]
    b1, b2, b3 = b[0, :, 0], b[1, :, 0], b[2, :, 0]
    h1 = jnp.tanh(x @ w1.T + b1)
    h2 = jnp.tanh((x + h1) @ w2.T + b2)
    return h2 @ w3.T + b3


if __name__ == "__main__":
    input_dim = 32
    hidden_dim = 32     # must equal input_dim for the residual add
    batch = 256         # multiple of 128 -> lane-dense tiles, 2 grid steps

    key = jax.random.PRNGKey(0)
    kx, kp = jax.random.split(key)
    x = jax.random.normal(kx, (batch, input_dim), dtype=jnp.float32)
    W, b = init_params(kp, input_dim, hidden_dim)

    ref = res_reference(x, W, b)

    # f32 path
    out = jax.block_until_ready(res_forward(x, W, b))
    assert out.shape == (batch, input_dim)
    assert jnp.allclose(out, ref, atol=1e-4, rtol=1e-4), "f32 mismatch vs reference"

    # ragged-batch / lane-padding path
    out_small = jax.block_until_ready(res_forward(x[:50], W, b))
    assert out_small.shape == (50, input_dim)
    assert jnp.allclose(out_small, ref[:50], atol=1e-4, rtol=1e-4), "padded-batch mismatch"

    # bf16 HBM-I/O path (v6e/v7x bandwidth lever); f32 accumulation inside
    out_bf16 = jax.block_until_ready(res_forward(x, W, b, io_dtype=jnp.bfloat16))
    assert jnp.allclose(out_bf16.astype(jnp.float32), ref, atol=5e-2, rtol=5e-2), \
        "bf16 mismatch vs reference"

    print("KERNEL_OK")
</pallas_src>

<mosaic_0001>
module attributes {stable_mosaic.version = 11 : i64} {
  func.func @res_kernel(%arg0: i32, %arg1: memref<32x128xf32, #tpu.memory_space<vmem>>, %arg2: memref<3x32x32xf32, #tpu.memory_space<vmem>>, %arg3: memref<3x32x1xf32, #tpu.memory_space<vmem>>, %arg4: memref<32x128xf32, #tpu.memory_space<vmem>>) attributes {dimension_semantics = [#tpu.dimension_semantics<parallel>], iteration_bounds = array<i64: 2>, scalar_prefetch = 0 : i64, scratch_operands = 0 : i64, tpu.core_type = #tpu.core_type<tc>, window_params = [{transform_indices = @transform_0, window_bounds = array<i64: 32, 128>}, {pipeline_mode = #tpu.pipeline_mode<synchronous>, transform_indices = @transform_1, window_bounds = array<i64: 3, 32, 32>}, {pipeline_mode = #tpu.pipeline_mode<synchronous>, transform_indices = @transform_2, window_bounds = array<i64: 3, 32, 1>}, {transform_indices = @transform_3, window_bounds = array<i64: 32, 128>}]} {
    %c0 = arith.constant 0 : index
    %c0_0 = arith.constant 0 : index
    %0 = vector.load %arg1[%c0, %c0_0] : memref<32x128xf32, #tpu.memory_space<vmem>>, vector<32x128xf32>
    %c0_1 = arith.constant 0 : index
    %c0_2 = arith.constant 0 : index
    %c0_3 = arith.constant 0 : index
    %1 = vector.load %arg2[%c0_1, %c0_2, %c0_3] : memref<3x32x32xf32, #tpu.memory_space<vmem>>, vector<1x32x32xf32>
    %2 = vector.shape_cast %1 : vector<1x32x32xf32> to vector<32x32xf32>
    %c1 = arith.constant 1 : index
    %c0_4 = arith.constant 0 : index
    %c0_5 = arith.constant 0 : index
    %3 = vector.load %arg2[%c1, %c0_4, %c0_5] : memref<3x32x32xf32, #tpu.memory_space<vmem>>, vector<1x32x32xf32>
    %4 = vector.shape_cast %3 : vector<1x32x32xf32> to vector<32x32xf32>
    %c2 = arith.constant 2 : index
    %c0_6 = arith.constant 0 : index
    %c0_7 = arith.constant 0 : index
    %5 = vector.load %arg2[%c2, %c0_6, %c0_7] : memref<3x32x32xf32, #tpu.memory_space<vmem>>, vector<1x32x32xf32>
    %6 = vector.shape_cast %5 : vector<1x32x32xf32> to vector<32x32xf32>
    %c0_8 = arith.constant 0 : index
    %c0_9 = arith.constant 0 : index
    %c0_10 = arith.constant 0 : index
    %7 = vector.load %arg3[%c0_8, %c0_9, %c0_10] : memref<3x32x1xf32, #tpu.memory_space<vmem>>, vector<1x32x1xf32>
    %8 = vector.shape_cast %7 : vector<1x32x1xf32> to vector<32x1xf32>
    %c1_11 = arith.constant 1 : index
    %c0_12 = arith.constant 0 : index
    %c0_13 = arith.constant 0 : index
    %9 = vector.load %arg3[%c1_11, %c0_12, %c0_13] : memref<3x32x1xf32, #tpu.memory_space<vmem>>, vector<1x32x1xf32>
    %10 = vector.shape_cast %9 : vector<1x32x1xf32> to vector<32x1xf32>
    %c2_14 = arith.constant 2 : index
    %c0_15 = arith.constant 0 : index
    %c0_16 = arith.constant 0 : index
    %11 = vector.load %arg3[%c2_14, %c0_15, %c0_16] : memref<3x32x1xf32, #tpu.memory_space<vmem>>, vector<1x32x1xf32>
    %12 = vector.shape_cast %11 : vector<1x32x1xf32> to vector<32x1xf32>
    %cst = arith.constant dense<0.000000e+00> : vector<32x128xf32>
    %13 = tpu.matmul %2, %0, %cst {dimension_numbers = #tpu.dot_dimension_numbers<[1], [0], [0], [1], [0, 0, 1, 1], [], []>} : vector<32x32xf32>, vector<32x128xf32>, vector<32x128xf32> -> vector<32x128xf32>
    %14 = vector.broadcast %8 : vector<32x1xf32> to vector<32x128xf32>
    %15 = arith.addf %13, %14 : vector<32x128xf32>
    %16 = math.tanh %15 : vector<32x128xf32>
    %17 = arith.addf %0, %16 : vector<32x128xf32>
    %cst_17 = arith.constant dense<0.000000e+00> : vector<32x128xf32>
    %18 = tpu.matmul %4, %17, %cst_17 {dimension_numbers = #tpu.dot_dimension_numbers<[1], [0], [0], [1], [0, 0, 1, 1], [], []>} : vector<32x32xf32>, vector<32x128xf32>, vector<32x128xf32> -> vector<32x128xf32>
    %19 = vector.broadcast %10 : vector<32x1xf32> to vector<32x128xf32>
    %20 = arith.addf %18, %19 : vector<32x128xf32>
    %21 = math.tanh %20 : vector<32x128xf32>
    %cst_18 = arith.constant dense<0.000000e+00> : vector<32x128xf32>
    %22 = tpu.matmul %6, %21, %cst_18 {dimension_numbers = #tpu.dot_dimension_numbers<[1], [0], [0], [1], [0, 0, 1, 1], [], []>} : vector<32x32xf32>, vector<32x128xf32>, vector<32x128xf32> -> vector<32x128xf32>
    %23 = vector.broadcast %12 : vector<32x1xf32> to vector<32x128xf32>
    %24 = arith.addf %22, %23 : vector<32x128xf32>
    %c0_19 = arith.constant 0 : index
    %c0_20 = arith.constant 0 : index
    %25 = vector.load %arg4[%c0_19, %c0_20] : memref<32x128xf32, #tpu.memory_space<vmem>>, vector<32x128xf32>
    tpu.vector_store %arg4[%c0_19, %c0_20], %24 {strides = array<i32>} : memref<32x128xf32, #tpu.memory_space<vmem>>, vector<32x128xf32>,
    return
  }
  func.func @transform_0(%arg0: i32) -> (i32, i32) {
    %c0_i32 = arith.constant 0 : i32
    %c0_i32_0 = arith.constant 0 : i32
    return %c0_i32, %arg0 : i32, i32
  }
  func.func @transform_1(%arg0: i32) -> (i32, i32, i32) {
    %c0_i32 = arith.constant 0 : i32
    %c0_i32_0 = arith.constant 0 : i32
    %c0_i32_1 = arith.constant 0 : i32
    %c0_i32_2 = arith.constant 0 : i32
    return %c0_i32, %c0_i32_0, %c0_i32_1 : i32, i32, i32
  }
  func.func @transform_2(%arg0: i32) -> (i32, i32, i32) {
    %c0_i32 = arith.constant 0 : i32
    %c0_i32_0 = arith.constant 0 : i32
    %c0_i32_1 = arith.constant 0 : i32
    %c0_i32_2 = arith.constant 0 : i32
    return %c0_i32, %c0_i32_0, %c0_i32_1 : i32, i32, i32
  }
  func.func @transform_3(%arg0: i32) -> (i32, i32) {
    %c0_i32 = arith.constant 0 : i32
    %c0_i32_0 = arith.constant 0 : i32
    return %c0_i32, %arg0 : i32, i32
  }
}

</mosaic_0001>

<bundles_post_ra>
// kernel: tpu_custom_call.1
= control target key start
LH: loop header
LB: loop body
LE: loop exit
PB: predicated region body
PF: predicated region fallthrough
CT: control target
= control target key end

     0   :  { %8 = vsyncpa [#allocation3], 0  ;;  %s1241_s0 = inlined_call_operand.hbm [shape: f32[32,256], index: 0, kind: input, shape index: {}]   ;;  %s1242_s1 = inlined_call_operand.vmem [shape: f32[3,32,32], index: 1, kind: input, shape index: {}]   ;;  %s1243_s2 = inlined_call_operand.vmem [shape: f32[3,32,1], index: 2, kind: input, shape index: {}]   ;;  %s1244_s3 = inlined_call_operand.hbm [shape: f32[32,256], index: 3, kind: output, shape index: {}]  }
   0x1   :  { %10 = vsyncpa [#allocation3 + $0x1], 0 }
   0x2   :  { %11 = vsyncpa [#allocation4], 0 }
   0x3   :  { %13 = vsyncpa [#allocation4 + $0x1], 0  ;;  %s982_s12 = smov 0   ;;  %s984_s13 = smov 0  }
   0x4   :  { %s986_s14 = smov 0   ;;  %s988_s15 = smov 0  }
   0x5 LB: > { %s1003_s16 = sadd.s32 4294967295, %s951_s15   ;;  %s674_s17 = sadd.s32 4294967294, %s951_s15   ;;  %s951_s15 = sphi %s988_s15, %s1260_s15   ;;  %s947_s14 = sphi %s986_s14, %s1259_s14   ;;  %s943_s13 = sphi %s984_s13, %s1258_s13   ;;  %s939_s12 = sphi %s982_s12, %s1257_s12  }
   0x6   : > { %s1007_s18 = sadd.s32 1, %s951_s15   ;;  %s26_s19 = sadd.s32 1, %s947_s14 }
   0x7   : > { %s23_s20 = ssub.s32 %s951_s15, %s1007_s18  ;;  %p33_p0 = scmp.ne.s32.totalorder %s947_s14, %s943_s13 }
   0x8   : > { %p24_p1 = scmp.eq.s32.totalorder %s23_s20, 0  ;;  %p34_p2 = scmp.eq.s32.totalorder %s951_s15, 0 }
   0x9   : > { %p39_p3 = scmp.ne.s32.totalorder %s943_s13, %s939_s12  ;;  %p40_p4 = scmp.eq.s32.totalorder %s1003_s16, 0 }
   0xa   : > { %s1019_s21 = scalar_select %p24_p1, %s947_s14, %s26_s19  }
   0xb   : > { %p1021_p5 = por %p34_p2, %p33_p0  ;;  %p1025_p6 = por %p40_p4, %p39_p3 }
   0xc   : > { %p105_p7 = scmp.eq.s32.totalorder %s1003_s16, 1  ;;  %p111_p8 = scmp.eq.s32.totalorder %s674_s17, 1 }
   0xd   : > { %s1248_s23 = scalar_select %p1025_p6, 1, 0 }
   0xe   : > { %p800_p10 = scmp.lt.s32.totalorder %s951_s15, 2  ;;  %p1032_p11 = por %p105_p7, %p33_p0 }
   0xf   : > { %p1036_p12 = por %p111_p8, %p39_p3  ;;  %s137_s26 = sand.u32 1, %s947_s14  }
  0x10   : > { %s1249_s24 = scalar_select %p1032_p11, 1, 0 }
  0x11   : > { %s1250_s25 = scalar_select %p1036_p12, 1, 0 }
  0x12   : > { %s678_s27 = sshll.u32 %s951_s15, 7  ;;  %s677_s28 = sshll.u32 %s137_s26, 5 }
  0x13   : > { %s1045_s4 = scalar_lea.hbm %s1241_s0, %s678_s27  ;;  %s141_s5 = scalar_lea.vmem [#allocation2], %s677_s28 }
  0x14   : > { %s147_s6 = sshll.u32 %s141_s5, 4  ;;  %p1049_p13 = pnand %p800_p10, %p1021_p5  ;;  %s1053_s6 = int_to_ptr.vmem [resolvable:$true] %s147_s6 }
  0x15   : > { %s1056_s8 = scalar_lea.sflag [#allocation3], %s137_s26  ;;  %s859_s9 = scalar_lea.hbm %s1045_s4, 512 }
  0x16   : > { %p860_p1 = scmp.ne.s32.totalorder %s1045_s4, %s859_s9  ;;  %p861_p2 = pneg %p1049_p13 }
  0x17   : > { %s864_s17 = scalar_lea.hbm %s1241_s0, 1024  ;;  %p865_p5 = scmp.lt.s32.totalorder %s1045_s4, %s1241_s0 }
  0x18   : > { %p862_p3 = pnand %p861_p2, %p860_p1  ;;  %p866_p7 = scmp.lt.s32.totalorder %s864_s17, %s859_s9 }
  0x1a   : > { %p863_p4 = pneg %p862_p3  ;;  %p867_p8 = por %p866_p7, %p865_p5 }
  0x1c   : > { %p868_p10 = pnand %p867_p8, %p863_p4 }
  0x1e   : > { %871 = shalt.err (!%p868_p10)
}
  0x1f   : > { %s872_s22 = scalar_lea.vmem %s1053_s6, 512  ;;  %s953_s26 = smov [#allocation2]  }
  0x20   : > { %p873_p9 = scmp.ne.s32.totalorder %s1053_s6, %s872_s22  ;;  %s877_s27 = sshll.u32 %s953_s26, 4  ;;  %s878_s27 = int_to_ptr.vmem [resolvable:$false] %s877_s27 }
  0x21   : > { %s879_s28 = scalar_lea.vmem %s878_s27, 1024  ;;  %p880_p3 = scmp.lt.s32.totalorder %s1053_s6, %s878_s27 }
  0x22   : > { %p875_p0 = pnand %p873_p9, %p861_p2  ;;  %p881_p12 = scmp.lt.s32.totalorder %s879_s28, %s872_s22 }
  0x24   : > { %p876_p1 = pneg %p875_p0  ;;  %p882_p11 = por %p881_p12, %p880_p3 }
  0x26   : > { %p883_p6 = pnand %p882_p11, %p876_p1 }
  0x28   : > { %886 = shalt.err (!%p883_p6)
}
  0x29   : > { %s954_s29 = smov 256   ;;  %s955_s30 = smov 128  }
  0x2a   : > { %s956_s5 = smov 8   ;;  %p155_p9 = scmp.lt.s32.totalorder %s951_s15, 3 }
  0x2b   : > { %795 = dma.hbm_to_vmem [thread:$0]  (!%p1049_p13), %s1045_s4, 512, %s1053_s6, %s1056_s8, %s954_s29, %s955_s30, %s956_s5  }
  0x2c   : > { %p1252_p0 = scmp.ge.s32.totalorder %s951_s15, 1 }
  0x2e   : > { %p156_p2 = pnand %p1252_p0, %p155_p9 }
  0x2f   : > { %s1081_s9 = sand.u32 (!%p156_p2), 1, %s943_s13   ;;  %p1253_p6 = scmp.ne.s32.totalorder (!%p156_p2), %s1248_s23, 0 }
  0x30   : > { %159 = sbr.rel (%p156_p2) target bundleno = 720 (0x2d0), region = 32  ;;  %s680_s10 = sshll.u32 (!%p156_p2), %s1081_s9, 5 }
  0x31   : > { %s162_s11 = scalar_lea.sflag (!%p156_p2), [#allocation3], %s1081_s9  ;;  %s165_s17 = scalar_lea.vmem (!%p156_p2), [#allocation2], %s680_s10 }
  0x35   : > { %930 = dma.done.wait (%p1253_p6), %s162_s11, 512  }
  0x36   : > { %932 = vsyncadd (%p1253_p6), %s162_s11, 4294966784  ;;  %v957_v0 = vmov 0   ;;  %vm240_vm0 = vcmask 261120   ;;  %v1091_v1 = vld [vmem:[%s165_s17 + $0x18] sm:$0xff]  ;;  %v1093_v2 = vld [vmem:[%s165_s17 + $0x10] sm:$0xff]  ;;  %s187_s4 = scalar_lea.vmem [#allocation5], %s680_s10 }
  0x37   : > { %841 = vset.pattern.permute.xlu0 %v957_v0  ;;  %842 = vset.pattern.permute.xlu1 %v957_v0  ;;  %v192_v3 = vld [vmem:[%s1242_s1] sm:$0xff]  ;;  %v1100_v4 = vld [vmem:[%s165_s17 + $0x8] sm:$0xff]  ;;  %v209_v5 = vld [vmem:[%s1243_s2 + $0x18] sm:$0xff]  ;;  %s601_s6 = sshll.u32 %s187_s4, 4  ;;  %s711_s23 = sshll.u32 %s1003_s16, 7  ;;  %s1193_s6 = int_to_ptr.vmem [resolvable:$true] %s601_s6 }
  0x38   : > { %738 = vmatprep.subr.mxu0 %v1091_v1  ;;  %746 = vmatprep.mubr.msk.f32.mxu0 %vm240_vm0, %v192_v3  ;;  %v207_v6 = vld [vmem:[%s1243_s2 + $0x8] sm:$0xff]  ;;  %v188_v7 = vld [vmem:[%s165_s17] sm:$0xff]  ;;  %v208_v8 = vld [vmem:[%s1243_s2 + $0x10] sm:$0xff]  ;;  %s1198_s10 = scalar_lea.hbm %s1244_s3, %s711_s23  ;;  %s589_s16 = scalar_lea.sflag [#allocation4], %s1081_s9 }
  0x39   : > { %739 = vmatpush3.msra.mxu0 %v1091_v1  ;;  %237 = vperm.xlu0 %841, %v209_v5   ;;  %v206_v9 = vld [vmem:[%s1243_s2] sm:$0xff]  ;;  %v193_v10 = vld [vmem:[%s1242_s1 + $0x8] sm:$0xff]  ;;  %v194_v11 = vld [vmem:[%s1242_s1 + $0x10] sm:$0xff]  ;;  %s887_s19 = scalar_lea.vmem %s1193_s6, 512  ;;  %p1254_p12 = scmp.ne.s32.totalorder %s1249_s24, 0 }
  0x3a   : > { %740 = vmatprep.subr.mxu0 %v1093_v2  ;;  %227 = vperm.xlu1 %842, %v207_v6   ;;  %v693_v12 = vld [vmem:[%s1243_s2 + $0x38] sm:$0xff]  ;;  %v692_v13 = vld [vmem:[%s1243_s2 + $0x30] sm:$0xff]  ;;  %v691_v15 = vld [vmem:[%s1243_s2 + $0x28] sm:$0xff]  ;;  %p888_p11 = scmp.ne.s32.totalorder %s1193_s6, %s887_s19  ;;  %s958_s20 = smov [#allocation5]  }
  0x3b   : > { %741 = vmatpush3.msra.mxu0 %v1093_v2  ;;  %v195_v14 = vld [vmem:[%s1242_s1 + $0x18] sm:$0xff]  ;;  %v690_v16 = vld [vmem:[%s1243_s2 + $0x20] sm:$0xff]  ;;  %v695_v18 = vld [vmem:[%s1243_s2 + $0x48] sm:$0xff]  ;;  %s891_s22 = sshll.u32 %s958_s20, 4  ;;  %s892_s22 = int_to_ptr.vmem [resolvable:$false] %s891_s22 }
  0x3c   : > { %742 = vmatprep.subr.mxu0 %v1100_v4  ;;  %v694_v17 = vld [vmem:[%s1243_s2 + $0x40] sm:$0xff]  ;;  %v696_v19 = vld [vmem:[%s1243_s2 + $0x50] sm:$0xff]  ;;  %v697_v20 = vld [vmem:[%s1243_s2 + $0x58] sm:$0xff]  ;;  %p889_p13 = pnand %p888_p11, %p1254_p12  ;;  %s893_s26 = scalar_lea.vmem %s892_s22, 1024 }
  0x3d   : > { %743 = vmatpush3.msra.mxu0 %v1100_v4  ;;  %232 = vperm.xlu0 %841, %v208_v8   ;;  %v682_v21 = vld [vmem:[%s1242_s1 + $0x20] sm:$0xff]  ;;  %v683_v42 = vld [vmem:[%s1242_s1 + $0x28] sm:$0xff]  ;;  %v684_v43 = vld [vmem:[%s1242_s1 + $0x30] sm:$0xff]  ;;  %p894_p5 = scmp.lt.s32.totalorder %s1193_s6, %s892_s22  ;;  %p895_p7 = scmp.lt.s32.totalorder %s893_s26, %s887_s19 }
  0x3e   : > { %744 = vmatprep.subr.mxu0 %v188_v7  ;;  %222 = vperm.xlu1 %842, %v206_v9   ;;  %v685_v44 = vld [vmem:[%s1242_s1 + $0x38] sm:$0xff]  ;;  %v686_v45 = vld [vmem:[%s1242_s1 + $0x40] sm:$0xff]  ;;  %v688_v46 = vld [vmem:[%s1242_s1 + $0x50] sm:$0xff]  ;;  %p890_p4 = pneg %p889_p13 }
  0x3f   : > { %745 = vmatpush3.msra.mxu0 %v188_v7  ;;  %760 = vmatprep.mubr.msk.f32.mxu1 %vm240_vm0, %v682_v21  ;;  %v687_v63 = vld [vmem:[%s1242_s1 + $0x48] sm:$0xff]  ;;  %v689_v0 = vld [vmem:[%s1242_s1 + $0x58] sm:$0xff]  ;;  %p896_p8 = por %p895_p7, %p894_p5 }
  0x40   : > { %747 = vmatmul.mubr.msk.f32.vlgmr.msra.gmra.mxu0 %vm240_vm0, %v193_v10 }
  0x41   : > { %749 = vmatprep.mubr.msk.f32.mxu0 %vm240_vm0, %v194_v11  ;;  %363 = vperm.xlu0 %841, %v693_v12   ;;  %p897_p10 = pnand %p896_p8, %p890_p4 }
  0x42   : > { %358 = vperm.xlu1 %842, %v692_v13  }
  0x44   : > { %750 = vmatmul.mubr.msk.f32.gmra.mxu0 %vm240_vm0, %v195_v14 }
  0x45   : > { %353 = vperm.xlu0 %841, %v691_v15   ;;  %774 = vmatprep.mubr.msk.f32.mxu0 %vm240_vm0, %v686_v45 }
  0x46   : > { %348 = vperm.xlu1 %842, %v690_v16  }
  0x49   : > { %469 = vperm.xlu0 %841, %v694_v17  }
  0x4a   : > { %474 = vperm.xlu1 %842, %v695_v18  }
  0x4d   : > { %479 = vperm.xlu0 %841, %v696_v19  }
  0x4e   : > { %484 = vperm.xlu1 %842, %v697_v20  }
  0xb4   : > { %v238_v22 = vpop.permute.xlu0 %237 }
  0xb5   : > { %v228_v23 = vpop.permute.xlu1 %227 }
  0xb8   : > { %v233_v28 = vpop.permute.xlu0 %232 }
  0xb9   : > { %v223_v30 = vpop.permute.xlu1 %222 }
  0xbc   : > { %v364_v47 = vpop.permute.xlu0 %363 }
  0xbd   : > { %v359_v49 = vpop.permute.xlu1 %358 }
  0xc0   : > { %v354_v53 = vpop.permute.xlu0 %353 }
  0xc1   : > { %v349_v57 = vpop.permute.xlu1 %348 }
 0x100   : > { %v748_v24 = vpop.f32.mrf.mxu0 }
 0x101   : > { %v325_v26 = vadd.f32 %v748_v24, %v228_v23 }
 0x102   : > { %v319_v25 = vpop.f32.mrf.mxu0 }
 0x103   : > { %v320_v32 = vadd.f32 %v319_v25, %v223_v30 }
 0x104   : > { %v751_v27 = vpop.f32.mrf.mxu0 }
 0x105   : > { %v335_v29 = vadd.f32 %v751_v27, %v238_v22 }
 0x106   : > { %v329_v31 = vpop.f32.mrf.mxu0 }
 0x107   : > { %843 = vtanh.f32 %v335_v29  ;;  %v330_v33 = vadd.f32 %v329_v31, %v233_v28 }
 0x108   : > { %845 = vtanh.f32 %v325_v26 }
 0x109   : > { %847 = vtanh.f32 %v330_v33 }
 0x10a   : > { %849 = vtanh.f32 %v320_v32 }
 0x114   : > { %v844_v34 = vpop.eup %843 }
 0x115   : > { %v846_v35 = vpop.eup %845  ;;  %v345_v36 = vadd.f32 %v844_v34, %v1091_v1  ;;  %v475_v1 = vpop.permute.xlu1 %474 }
 0x116   : > { %v848_v37 = vpop.eup %847  ;;  %v343_v40 = vadd.f32 %v846_v35, %v1100_v4 }
 0x117   : > { %752 = vmatprep.subr.mxu1 %v345_v36  ;;  %v344_v38 = vadd.f32 %v848_v37, %v1093_v2  ;;  %v850_v39 = vpop.eup %849  ;;  %v470_v2 = vpop.permute.xlu0 %469 }
 0x118   : > { %753 = vmatpush3.msra.mxu1 %v345_v36  ;;  %v342_v41 = vadd.f32 %v850_v39, %v188_v7 }
 0x119   : > { %754 = vmatprep.subr.mxu1 %v344_v38  ;;  %v485_v3 = vpop.permute.xlu1 %484 }
 0x11a   : > { %755 = vmatpush3.msra.mxu1 %v344_v38 }
 0x11b   : > { %756 = vmatprep.subr.mxu1 %v343_v40  ;;  %v480_v6 = vpop.permute.xlu0 %479 }
 0x11c   : > { %757 = vmatpush3.msra.mxu1 %v343_v40 }
 0x11d   : > { %758 = vmatprep.subr.mxu1 %v342_v41 }
 0x11e   : > { %759 = vmatpush3.msra.mxu1 %v342_v41 }
 0x11f   : > { %761 = vmatmul.mubr.msk.f32.vlgmr.msra.gmra.mxu1 %vm240_vm0, %v683_v42 }
 0x120   : > { %763 = vmatprep.mubr.msk.f32.mxu1 %vm240_vm0, %v684_v43 }
 0x123   : > { %764 = vmatmul.mubr.msk.f32.gmra.mxu1 %vm240_vm0, %v685_v44 }
 0x124   : > { %777 = vmatprep.mubr.msk.f32.mxu1 %vm240_vm0, %v688_v46 }
 0x1df   : > { %v762_v48 = vpop.f32.mrf.mxu1 }
 0x1e0   : > { %v450_v55 = vadd.f32 %v762_v48, %v354_v53 }
 0x1e1   : > { %v444_v50 = vpop.f32.mrf.mxu1 }
 0x1e2   : > { %v445_v58 = vadd.f32 %v444_v50, %v349_v57 }
 0x1e3   : > { %v765_v51 = vpop.f32.mrf.mxu1 }
 0x1e4   : > { %v460_v52 = vadd.f32 %v765_v51, %v364_v47 }
 0x1e5   : > { %v454_v54 = vpop.f32.mrf.mxu1 }
 0x1e6   : > { %851 = vtanh.f32 %v460_v52  ;;  %v455_v56 = vadd.f32 %v454_v54, %v359_v49 }
 0x1e8   : > { %853 = vtanh.f32 %v455_v56 }
 0x1e9   : > { %855 = vtanh.f32 %v450_v55 }
 0x1ea   : > { %857 = vtanh.f32 %v445_v58 }
 0x1f3   : > { %v852_v59 = vpop.eup %851 }
 0x1f4   : > { %766 = vmatprep.subr.mxu0 %v852_v59  ;;  %780 = vmatprep.subr.mxu1 %v852_v59 }
 0x1f5   : > { %v854_v60 = vpop.eup %853  ;;  %767 = vmatpush3.msra.mxu0 %v852_v59  ;;  %784 = vmatpush3.msra.mxu1 %v852_v59 }
 0x1f6   : > { %768 = vmatprep.subr.mxu0 %v854_v60  ;;  %781 = vmatprep.subr.mxu1 %v854_v60  ;;  %v856_v61 = vpop.eup %855 }
 0x1f7   : > { %769 = vmatpush3.msra.mxu0 %v854_v60  ;;  %785 = vmatpush3.msra.mxu1 %v854_v60  ;;  %v858_v62 = vpop.eup %857 }
 0x1f8   : > { %770 = vmatprep.subr.mxu0 %v856_v61  ;;  %782 = vmatprep.subr.mxu1 %v856_v61 }
 0x1f9   : > { %771 = vmatpush3.msra.mxu0 %v856_v61  ;;  %786 = vmatpush3.msra.mxu1 %v856_v61 }
 0x1fa   : > { %772 = vmatprep.subr.mxu0 %v858_v62  ;;  %783 = vmatprep.subr.mxu1 %v858_v62 }
 0x1fb   : > { %773 = vmatpush3.msra.mxu0 %v858_v62  ;;  %787 = vmatpush3.msra.mxu1 %v858_v62 }
 0x1fc   : > { %775 = vmatmul.mubr.msk.f32.vlgmr.msra.gmra.mxu0 %vm240_vm0, %v687_v63  ;;  %778 = vmatmul.mubr.msk.f32.vlgmr.msra.gmra.mxu1 %vm240_vm0, %v689_v0 }
 0x2bc   : > { %v776_v4 = vpop.f32.mrf.mxu0  ;;  %v779_v5 = vpop.f32.mrf.mxu1 }
 0x2bd   : > { %v571_v7 = vadd.f32 %v776_v4, %v475_v1  ;;  %v581_v8 = vadd.f32 %v779_v5, %v485_v3 }
 0x2be   : > { %v565_v9 = vpop.f32.mrf.mxu0  ;;  %v575_v10 = vpop.f32.mrf.mxu1 }
 0x2bf   : > { %585 = vst [vmem:[%s187_s4 + $0x8] sm:$0xff] %v571_v7  ;;  %587 = vst [vmem:[%s187_s4 + $0x18] sm:$0xff] %v581_v8  ;;  %v566_v11 = vadd.f32 %v565_v9, %v470_v2  ;;  %v576_v12 = vadd.f32 %v575_v10, %v480_v6 }
 0x2c1   : > { %584 = vst [vmem:[%s187_s4] sm:$0xff] %v566_v11  ;;  %586 = vst [vmem:[%s187_s4 + $0x10] sm:$0xff] %v576_v12 }
 0x2c2   : > { %900 = shalt.err (!%p897_p10)
}
 0x2c3   : > { %s901_s27 = scalar_lea.hbm %s1198_s10, 512  ;;  %s905_s30 = scalar_lea.hbm %s1244_s3, 1024 }
 0x2c4   : > { %p902_p1 = scmp.ne.s32.totalorder %s1198_s10, %s901_s27  ;;  %p906_p0 = scmp.lt.s32.totalorder %s1198_s10, %s1244_s3 }
 0x2c5   : > { %p907_p2 = scmp.lt.s32.totalorder %s905_s30, %s901_s27 }
 0x2c6   : > { %p903_p3 = pnand %p902_p1, %p1254_p12 }
 0x2c7   : > { %p908_p6 = por %p907_p2, %p906_p0 }
 0x2c8   : > { %p904_p9 = pneg %p903_p3 }
 0x2ca   : > { %p909_p11 = pnand %p908_p6, %p904_p9 }
 0x2cc   : > { %912 = shalt.err (!%p909_p11)
}
 0x2cd   : > { %s959_s17 = smov 128   ;;  %s960_s4 = smov 256  }
 0x2ce   : > { %s961_s23 = smov 8  }
 0x2cf   : > { %790 = dma.vmem_to_hbm [thread:$0]  (%p1254_p12), %s1193_s6, 512, %s1198_s10, %s589_s16, %s959_s17, %s960_s4, %s961_s23  }
 0x2d0 PF: > { %s616_s7 = sand.u32 1, %s939_s12   ;;  %p1255_p13 = scmp.ne.s32.totalorder %s1250_s25, 0 }
 0x2d1   : > { %p1256_p4 = scmp.ge.s32.totalorder %s951_s15, 2  ;;  %s617_s8 = scalar_lea.sflag [#allocation4], %s616_s7 }
 0x2d3   : > { %p797_p5 = pnand %p1256_p4, %p1255_p13 }
 0x2d5   : > { %p798_p7 = pneg %p797_p5 }
 0x2d7   : > { %934 = dma.done.wait (%p798_p7), %s617_s8, 512  }
 0x2d8   : > { %936 = vsyncadd (%p798_p7), %s617_s8, 4294966784  ;;  %p16_p8 = scmp.ge.s32.totalorder %s1007_s18, 4   ;;  %s1257_s12 = smov %s943_s13 }
 0x2d9   : > { %s1258_s13 = smov %s947_s14  ;;  %s1259_s14 = smov %s1019_s21 }
 0x2da   : > { %s1260_s15 = smov %s1007_s18  ;;  %18 = sbr.rel (!%p16_p8) target bundleno = 5 (0x5), region = 81 }
 0x2df   :  { %622 = vsyncpa [#allocation3], 1 }
 0x2e0   :  { %624 = vsyncpa [#allocation3 + $0x1], 1 }
 0x2e1   :  { %625 = vsyncpa [#allocation4], 1 }
 0x2e2   :  { %627 = vsyncpa [#allocation4 + $0x1], 1 }

</bundles_post_ra>
